<compile_context>
chip_gen: v5e
topology: v5e:2x2
jax: 0.10.0
libtpu: 0.0.40
codegen_flags: <defaults>
</compile_context>

<pallas_src>
import functools

import jax
import jax.numpy as jnp
from jax import lax
from jax.experimental import pallas as pl
from jax.experimental.pallas import tpu as pltpu


def _dwconv_kernel(x_ref, w_ref, b_ref, o_ref, pad_ref, *, H, W):
    # x_ref:   (1, H, W, TC)   unpadded input tile (one batch elem, one C tile)
    # w_ref:   (9, TC)         depthwise taps, index = dh*3 + dw
    # b_ref:   (1, TC)         bias
    # o_ref:   (1, H, W, TC)   output tile
    # pad_ref: (H+2, W+2, TC)  VMEM scratch holding the zero-padded tile
    TC = pad_ref.shape[-1]
    dt = pad_ref.dtype

    # Zero only the 1-pixel halo strips; the interior is overwritten below.
    # (Re-done every grid step so it is correct regardless of TC/core sharding.)
    pad_ref[0:1, :, :] = jnp.zeros((1, W + 2, TC), dt)
    pad_ref[H + 1:H + 2, :, :] = jnp.zeros((1, W + 2, TC), dt)
    pad_ref[1:H + 1, 0:1, :] = jnp.zeros((H, 1, TC), dt)
    pad_ref[1:H + 1, W + 1:W + 2, :] = jnp.zeros((H, 1, TC), dt)
    # Interior <- input tile (this is the in-kernel padding; no extra HBM pass).
    pad_ref[1:H + 1, 1:W + 1, :] = x_ref[0]

    # f32 accumulator initialized with the broadcast bias (saves one add pass).
    acc = jnp.broadcast_to(b_ref[...].astype(jnp.float32), (H, W, TC))

    # 3x3 depthwise conv as 9 shifted multiply-adds. The sublane (W) shift is
    # hoisted out of the dh loop: 3 misaligned W-slices instead of 9; the dh
    # shift is along a major axis (cheap vreg re-selection).
    for dw in range(3):
        xs = pad_ref[:, dw:dw + W, :].astype(jnp.float32)      # (H+2, W, TC)
        for dh in range(3):
            tap = w_ref[dh * 3 + dw, :].astype(jnp.float32)    # (TC,)
            acc = acc + xs[dh:dh + H] * tap
    o_ref[0] = acc.astype(o_ref.dtype)


def dwconv_pallas(x_bnc, weight, bias, H, W, *, block_c=128):
    """x_bnc: (B, N, C) with N == H*W. weight: (C, 1, 3, 3). bias: (C,)."""
    B, N, C = x_bnc.shape
    assert N == H * W
    assert block_c % 128 == 0, "channel tile must be lane-dense (multiple of 128)"

    # Pad channels up to a multiple of the lane-dense channel tile.
    Cp = ((C + block_c - 1) // block_c) * block_c
    cpad = Cp - C

    # (B, N, C) -> (B, H, W, C); n = h*W + w matches the NCHW pixel ordering,
    # so results match the PyTorch reference exactly.
    x = x_bnc.reshape(B, H, W, C)
    w9 = jnp.transpose(weight.reshape(C, 9), (1, 0))   # (9, C), row-major (dh, dw)
    b2 = bias.reshape(1, C)
    if cpad:
        x = jnp.pad(x, ((0, 0), (0, 0), (0, 0), (0, cpad)))
        w9 = jnp.pad(w9, ((0, 0), (0, cpad)))
        b2 = jnp.pad(b2, ((0, 0), (0, cpad)))

    kernel = functools.partial(_dwconv_kernel, H=H, W=W)

    out = pl.pallas_call(
        kernel,
        out_shape=jax.ShapeDtypeStruct((B, H, W, Cp), x_bnc.dtype),
        grid=(B, Cp // block_c),
        in_specs=[
            pl.BlockSpec((1, H, W, block_c), lambda b, c: (b, 0, 0, c)),
            pl.BlockSpec((9, block_c), lambda b, c: (0, c)),
            pl.BlockSpec((1, block_c), lambda b, c: (0, c)),
        ],
        out_specs=pl.BlockSpec((1, H, W, block_c), lambda b, c: (b, 0, 0, c)),
        scratch_shapes=[pltpu.VMEM((H + 2, W + 2, block_c), x.dtype)],
        compiler_params=pltpu.CompilerParams(
            dimension_semantics=("parallel", "parallel"),
            vmem_limit_bytes=32 * 1024 * 1024,
        ),
    )(x, w9, b2)

    if cpad:
        out = out[..., :C]
    return out.reshape(B, N, C)


def dwconv_reference(x_bnc, weight, bias, H, W):
    """Pure-JAX NCHW reference mirroring the PyTorch module exactly."""
    B, N, C = x_bnc.shape
    x = jnp.transpose(x_bnc, (0, 2, 1)).reshape(B, C, H, W)
    y = lax.conv_general_dilated(
        x, weight,
        window_strides=(1, 1),
        padding=((1, 1), (1, 1)),
        dimension_numbers=("NCHW", "OIHW", "NCHW"),
        feature_group_count=C,
    )
    y = y + bias.reshape(1, C, 1, 1)
    return jnp.transpose(y.reshape(B, C, N), (0, 2, 1))


def _run_case(key, B, C, H, W):
    N = H * W
    kx, kw, kb = jax.random.split(key, 3)
    x = jax.random.normal(kx, (B, N, C), dtype=jnp.float32)
    weight = jax.random.normal(kw, (C, 1, 3, 3), dtype=jnp.float32) * 0.1
    bias = jax.random.normal(kb, (C,), dtype=jnp.float32) * 0.1

    out = jax.block_until_ready(dwconv_pallas(x, weight, bias, H, W))
    ref = dwconv_reference(x, weight, bias, H, W)
    assert out.shape == (B, N, C)
    assert jnp.allclose(out, ref, atol=1e-5, rtol=1e-5), "mismatch vs reference"


if __name__ == "__main__":
    key = jax.random.PRNGKey(0)
    k0, k1 = jax.random.split(key, 2)

    # Main case: lane-aligned channels, exercises the (B, C/128) channel grid.
    _run_case(k0, B=2, C=256, H=8, W=8)
    # Small-C case: exercises the channel-padding (lane-dense) path.
    _run_case(k1, B=1, C=80, H=8, W=8)

    print("KERNEL_OK")
</pallas_src>

<mosaic_0001>
module attributes {stable_mosaic.version = 11 : i64} {
  func.func @_dwconv_kernel(%arg0: i32, %arg1: i32, %arg2: memref<1x8x8x128xf32, #tpu.memory_space<vmem>>, %arg3: memref<9x128xf32, #tpu.memory_space<vmem>>, %arg4: memref<1x128xf32, #tpu.memory_space<vmem>>, %arg5: memref<1x8x8x128xf32, #tpu.memory_space<vmem>>, %arg6: memref<10x10x128xf32, #tpu.memory_space<vmem>>) attributes {dimension_semantics = [#tpu.dimension_semantics<parallel>, #tpu.dimension_semantics<parallel>], iteration_bounds = array<i64: 2, 2>, scalar_prefetch = 0 : i64, scratch_operands = 1 : i64, tpu.core_type = #tpu.core_type<tc>, window_params = [{transform_indices = @transform_0, window_bounds = array<i64: 1, 8, 8, 128>}, {transform_indices = @transform_1, window_bounds = array<i64: 9, 128>}, {transform_indices = @transform_2, window_bounds = array<i64: 1, 128>}, {transform_indices = @transform_3, window_bounds = array<i64: 1, 8, 8, 128>}]} {
    %cst = arith.constant 0.000000e+00 : f32
    %0 = vector.broadcast %cst : f32 to vector<1x10x128xf32>
    %c0 = arith.constant 0 : index
    %c0_0 = arith.constant 0 : index
    %c0_1 = arith.constant 0 : index
    %1 = vector.load %arg6[%c0, %c0_0, %c0_1] : memref<10x10x128xf32, #tpu.memory_space<vmem>>, vector<1x10x128xf32>
    tpu.vector_store %arg6[%c0, %c0_0, %c0_1], %0 {strides = array<i32>} : memref<10x10x128xf32, #tpu.memory_space<vmem>>, vector<1x10x128xf32>,
    %cst_2 = arith.constant 0.000000e+00 : f32
    %2 = vector.broadcast %cst_2 : f32 to vector<1x10x128xf32>
    %c9 = arith.constant 9 : index
    %c0_3 = arith.constant 0 : index
    %c0_4 = arith.constant 0 : index
    %3 = vector.load %arg6[%c9, %c0_3, %c0_4] : memref<10x10x128xf32, #tpu.memory_space<vmem>>, vector<1x10x128xf32>
    tpu.vector_store %arg6[%c9, %c0_3, %c0_4], %2 {strides = array<i32>} : memref<10x10x128xf32, #tpu.memory_space<vmem>>, vector<1x10x128xf32>,
    %cst_5 = arith.constant 0.000000e+00 : f32
    %4 = vector.broadcast %cst_5 : f32 to vector<8x1x128xf32>
    %c1 = arith.constant 1 : index
    %c0_6 = arith.constant 0 : index
    %c0_7 = arith.constant 0 : index
    %5 = vector.load %arg6[%c1, %c0_6, %c0_7] : memref<10x10x128xf32, #tpu.memory_space<vmem>>, vector<8x1x128xf32>
    tpu.vector_store %arg6[%c1, %c0_6, %c0_7], %4 {strides = array<i32>} : memref<10x10x128xf32, #tpu.memory_space<vmem>>, vector<8x1x128xf32>,
    %cst_8 = arith.constant 0.000000e+00 : f32
    %6 = vector.broadcast %cst_8 : f32 to vector<8x1x128xf32>
    %c1_9 = arith.constant 1 : index
    %c9_10 = arith.constant 9 : index
    %c0_11 = arith.constant 0 : index
    %7 = vector.load %arg6[%c1_9, %c9_10, %c0_11] : memref<10x10x128xf32, #tpu.memory_space<vmem>>, vector<8x1x128xf32>
    tpu.vector_store %arg6[%c1_9, %c9_10, %c0_11], %6 {strides = array<i32>} : memref<10x10x128xf32, #tpu.memory_space<vmem>>, vector<8x1x128xf32>,
    %c0_12 = arith.constant 0 : index
    %c0_13 = arith.constant 0 : index
    %c0_14 = arith.constant 0 : index
    %c0_15 = arith.constant 0 : index
    %8 = vector.load %arg2[%c0_12, %c0_13, %c0_14, %c0_15] : memref<1x8x8x128xf32, #tpu.memory_space<vmem>>, vector<1x8x8x128xf32>
    %9 = vector.shape_cast %8 : vector<1x8x8x128xf32> to vector<8x8x128xf32>
    %c1_16 = arith.constant 1 : index
    %c1_17 = arith.constant 1 : index
    %c0_18 = arith.constant 0 : index
    %10 = vector.load %arg6[%c1_16, %c1_17, %c0_18] : memref<10x10x128xf32, #tpu.memory_space<vmem>>, vector<8x8x128xf32>
    tpu.vector_store %arg6[%c1_16, %c1_17, %c0_18], %9 {strides = array<i32>} : memref<10x10x128xf32, #tpu.memory_space<vmem>>, vector<8x8x128xf32>,
    %c0_19 = arith.constant 0 : index
    %c0_20 = arith.constant 0 : index
    %11 = vector.load %arg4[%c0_19, %c0_20] : memref<1x128xf32, #tpu.memory_space<vmem>>, vector<1x128xf32>
    %12 = vector.shape_cast %11 : vector<1x128xf32> to vector<1x1x128xf32>
    %13 = vector.broadcast %12 : vector<1x1x128xf32> to vector<8x8x128xf32>
    %c0_21 = arith.constant 0 : index
    %c0_22 = arith.constant 0 : index
    %c0_23 = arith.constant 0 : index
    %14 = vector.load %arg6[%c0_21, %c0_22, %c0_23] : memref<10x10x128xf32, #tpu.memory_space<vmem>>, vector<10x8x128xf32>
    %c0_24 = arith.constant 0 : index
    %c0_25 = arith.constant 0 : index
    %15 = vector.load %arg3[%c0_24, %c0_25] : memref<9x128xf32, #tpu.memory_space<vmem>>, vector<1x128xf32>
    %16 = vector.shape_cast %15 : vector<1x128xf32> to vector<128xf32>
    %17 = vector.extract_strided_slice %14 {offsets = [0, 0, 0], sizes = [8, 8, 128], strides = [1, 1, 1]} : vector<10x8x128xf32> to vector<8x8x128xf32>
    %18 = vector.shape_cast %16 : vector<128xf32> to vector<1x1x128xf32>
    %19 = vector.broadcast %18 : vector<1x1x128xf32> to vector<8x8x128xf32>
    %20 = arith.mulf %17, %19 : vector<8x8x128xf32>
    %21 = arith.addf %13, %20 : vector<8x8x128xf32>
    %c3 = arith.constant 3 : index
    %c0_26 = arith.constant 0 : index
    %22 = vector.load %arg3[%c3, %c0_26] : memref<9x128xf32, #tpu.memory_space<vmem>>, vector<1x128xf32>
    %23 = vector.shape_cast %22 : vector<1x128xf32> to vector<128xf32>
    %24 = vector.extract_strided_slice %14 {offsets = [1, 0, 0], sizes = [8, 8, 128], strides = [1, 1, 1]} : vector<10x8x128xf32> to vector<8x8x128xf32>
    %25 = vector.shape_cast %23 : vector<128xf32> to vector<1x1x128xf32>
    %26 = vector.broadcast %25 : vector<1x1x128xf32> to vector<8x8x128xf32>
    %27 = arith.mulf %24, %26 : vector<8x8x128xf32>
    %28 = arith.addf %21, %27 : vector<8x8x128xf32>
    %c6 = arith.constant 6 : index
    %c0_27 = arith.constant 0 : index
    %29 = vector.load %arg3[%c6, %c0_27] : memref<9x128xf32, #tpu.memory_space<vmem>>, vector<1x128xf32>
    %30 = vector.shape_cast %29 : vector<1x128xf32> to vector<128xf32>
    %31 = vector.extract_strided_slice %14 {offsets = [2, 0, 0], sizes = [8, 8, 128], strides = [1, 1, 1]} : vector<10x8x128xf32> to vector<8x8x128xf32>
    %32 = vector.shape_cast %30 : vector<128xf32> to vector<1x1x128xf32>
    %33 = vector.broadcast %32 : vector<1x1x128xf32> to vector<8x8x128xf32>
    %34 = arith.mulf %31, %33 : vector<8x8x128xf32>
    %35 = arith.addf %28, %34 : vector<8x8x128xf32>
    %c0_28 = arith.constant 0 : index
    %c1_29 = arith.constant 1 : index
    %c0_30 = arith.constant 0 : index
    %36 = vector.load %arg6[%c0_28, %c1_29, %c0_30] : memref<10x10x128xf32, #tpu.memory_space<vmem>>, vector<10x8x128xf32>
    %c1_31 = arith.constant 1 : index
    %c0_32 = arith.constant 0 : index
    %37 = vector.load %arg3[%c1_31, %c0_32] : memref<9x128xf32, #tpu.memory_space<vmem>>, vector<1x128xf32>
    %38 = vector.shape_cast %37 : vector<1x128xf32> to vector<128xf32>
    %39 = vector.extract_strided_slice %36 {offsets = [0, 0, 0], sizes = [8, 8, 128], strides = [1, 1, 1]} : vector<10x8x128xf32> to vector<8x8x128xf32>
    %40 = vector.shape_cast %38 : vector<128xf32> to vector<1x1x128xf32>
    %41 = vector.broadcast %40 : vector<1x1x128xf32> to vector<8x8x128xf32>
    %42 = arith.mulf %39, %41 : vector<8x8x128xf32>
    %43 = arith.addf %35, %42 : vector<8x8x128xf32>
    %c4 = arith.constant 4 : index
    %c0_33 = arith.constant 0 : index
    %44 = vector.load %arg3[%c4, %c0_33] : memref<9x128xf32, #tpu.memory_space<vmem>>, vector<1x128xf32>
    %45 = vector.shape_cast %44 : vector<1x128xf32> to vector<128xf32>
    %46 = vector.extract_strided_slice %36 {offsets = [1, 0, 0], sizes = [8, 8, 128], strides = [1, 1, 1]} : vector<10x8x128xf32> to vector<8x8x128xf32>
    %47 = vector.shape_cast %45 : vector<128xf32> to vector<1x1x128xf32>
    %48 = vector.broadcast %47 : vector<1x1x128xf32> to vector<8x8x128xf32>
    %49 = arith.mulf %46, %48 : vector<8x8x128xf32>
    %50 = arith.addf %43, %49 : vector<8x8x128xf32>
    %c7 = arith.constant 7 : index
    %c0_34 = arith.constant 0 : index
    %51 = vector.load %arg3[%c7, %c0_34] : memref<9x128xf32, #tpu.memory_space<vmem>>, vector<1x128xf32>
    %52 = vector.shape_cast %51 : vector<1x128xf32> to vector<128xf32>
    %53 = vector.extract_strided_slice %36 {offsets = [2, 0, 0], sizes = [8, 8, 128], strides = [1, 1, 1]} : vector<10x8x128xf32> to vector<8x8x128xf32>
    %54 = vector.shape_cast %52 : vector<128xf32> to vector<1x1x128xf32>
    %55 = vector.broadcast %54 : vector<1x1x128xf32> to vector<8x8x128xf32>
    %56 = arith.mulf %53, %55 : vector<8x8x128xf32>
    %57 = arith.addf %50, %56 : vector<8x8x128xf32>
    %c0_35 = arith.constant 0 : index
    %c2 = arith.constant 2 : index
    %c0_36 = arith.constant 0 : index
    %58 = vector.load %arg6[%c0_35, %c2, %c0_36] : memref<10x10x128xf32, #tpu.memory_space<vmem>>, vector<10x8x128xf32>
    %c2_37 = arith.constant 2 : index
    %c0_38 = arith.constant 0 : index
    %59 = vector.load %arg3[%c2_37, %c0_38] : memref<9x128xf32, #tpu.memory_space<vmem>>, vector<1x128xf32>
    %60 = vector.shape_cast %59 : vector<1x128xf32> to vector<128xf32>
    %61 = vector.extract_strided_slice %58 {offsets = [0, 0, 0], sizes = [8, 8, 128], strides = [1, 1, 1]} : vector<10x8x128xf32> to vector<8x8x128xf32>
    %62 = vector.shape_cast %60 : vector<128xf32> to vector<1x1x128xf32>
    %63 = vector.broadcast %62 : vector<1x1x128xf32> to vector<8x8x128xf32>
    %64 = arith.mulf %61, %63 : vector<8x8x128xf32>
    %65 = arith.addf %57, %64 : vector<8x8x128xf32>
    %c5 = arith.constant 5 : index
    %c0_39 = arith.constant 0 : index
    %66 = vector.load %arg3[%c5, %c0_39] : memref<9x128xf32, #tpu.memory_space<vmem>>, vector<1x128xf32>
    %67 = vector.shape_cast %66 : vector<1x128xf32> to vector<128xf32>
    %68 = vector.extract_strided_slice %58 {offsets = [1, 0, 0], sizes = [8, 8, 128], strides = [1, 1, 1]} : vector<10x8x128xf32> to vector<8x8x128xf32>
    %69 = vector.shape_cast %67 : vector<128xf32> to vector<1x1x128xf32>
    %70 = vector.broadcast %69 : vector<1x1x128xf32> to vector<8x8x128xf32>
    %71 = arith.mulf %68, %70 : vector<8x8x128xf32>
    %72 = arith.addf %65, %71 : vector<8x8x128xf32>
    %c8 = arith.constant 8 : index
    %c0_40 = arith.constant 0 : index
    %73 = vector.load %arg3[%c8, %c0_40] : memref<9x128xf32, #tpu.memory_space<vmem>>, vector<1x128xf32>
    %74 = vector.shape_cast %73 : vector<1x128xf32> to vector<128xf32>
    %75 = vector.extract_strided_slice %58 {offsets = [2, 0, 0], sizes = [8, 8, 128], strides = [1, 1, 1]} : vector<10x8x128xf32> to vector<8x8x128xf32>
    %76 = vector.shape_cast %74 : vector<128xf32> to vector<1x1x128xf32>
    %77 = vector.broadcast %76 : vector<1x1x128xf32> to vector<8x8x128xf32>
    %78 = arith.mulf %75, %77 : vector<8x8x128xf32>
    %79 = arith.addf %72, %78 : vector<8x8x128xf32>
    %c0_41 = arith.constant 0 : index
    %c0_42 = arith.constant 0 : index
    %c0_43 = arith.constant 0 : index
    %c0_44 = arith.constant 0 : index
    %80 = vector.load %arg5[%c0_41, %c0_42, %c0_43, %c0_44] : memref<1x8x8x128xf32, #tpu.memory_space<vmem>>, vector<1x8x8x128xf32>
    %81 = vector.shape_cast %80 : vector<1x8x8x128xf32> to vector<8x8x128xf32>
    %82 = vector.shape_cast %79 : vector<8x8x128xf32> to vector<1x8x8x128xf32>
    tpu.vector_store %arg5[%c0_41, %c0_42, %c0_43, %c0_44], %82 {strides = array<i32>} : memref<1x8x8x128xf32, #tpu.memory_space<vmem>>, vector<1x8x8x128xf32>,
    return
  }
  func.func @transform_0(%arg0: i32, %arg1: i32) -> (i32, i32, i32, i32) {
    %c0_i32 = arith.constant 0 : i32
    %c0_i32_0 = arith.constant 0 : i32
    %c0_i32_1 = arith.constant 0 : i32
    return %arg0, %c0_i32, %c0_i32_0, %arg1 : i32, i32, i32, i32
  }
  func.func @transform_1(%arg0: i32, %arg1: i32) -> (i32, i32) {
    %c0_i32 = arith.constant 0 : i32
    %c0_i32_0 = arith.constant 0 : i32
    return %c0_i32, %arg1 : i32, i32
  }
  func.func @transform_2(%arg0: i32, %arg1: i32) -> (i32, i32) {
    %c0_i32 = arith.constant 0 : i32
    %c0_i32_0 = arith.constant 0 : i32
    return %c0_i32, %arg1 : i32, i32
  }
  func.func @transform_3(%arg0: i32, %arg1: i32) -> (i32, i32, i32, i32) {
    %c0_i32 = arith.constant 0 : i32
    %c0_i32_0 = arith.constant 0 : i32
    %c0_i32_1 = arith.constant 0 : i32
    return %arg0, %c0_i32, %c0_i32_0, %arg1 : i32, i32, i32, i32
  }
}

</mosaic_0001>

<bundles_post_ra>
// kernel: tpu_custom_call.1
= control target key start
LH: loop header
LB: loop body
LE: loop exit
PB: predicated region body
PF: predicated region fallthrough
CT: control target
= control target key end

     0   :  { %s1510_s0 = inlined_call_operand.hbm [shape: f32[2,8,8,256], index: 0, kind: input, shape index: {}]   ;;  %s1511_s1 = inlined_call_operand.hbm [shape: f32[9,256], index: 1, kind: input, shape index: {}]   ;;  %s1512_s2 = inlined_call_operand.hbm [shape: f32[1,256], index: 2, kind: input, shape index: {}]   ;;  %s1513_s3 = inlined_call_operand.hbm [shape: f32[2,8,8,256], index: 3, kind: output, shape index: {}]  }
   0x1   :  { %1527 = sst [smem:[#allocation24_spill]] %s1511_s1 }
   0x2   :  { %1528 = sst [smem:[#allocation25_spill]] %s1513_s3 }
   0x3   :  { %8 = vsyncpa [#allocation4], 0 }
   0x4   :  { %10 = vsyncpa [#allocation4 + $0x1], 0 }
   0x5   :  { %11 = vsyncpa [#allocation7], 0 }
   0x6   :  { %13 = vsyncpa [#allocation7 + $0x1], 0 }
   0x7   :  { %14 = vsyncpa [#allocation5], 0 }
   0x8   :  { %16 = vsyncpa [#allocation5 + $0x1], 0  ;;  %s1059_s12 = smov 0   ;;  %s1061_s13 = smov 0  }
   0x9   :  { %s1063_s14 = smov 0   ;;  %s1065_s15 = smov 0  }
   0xa   :  { %s1067_s16 = smov 0   ;;  %s1069_s17 = smov 0  }
   0xb   :  { %s1071_s18 = smov 0   ;;  %s1073_s19 = smov 0  }
   0xc   :  { %s1075_s20 = smov 0   ;;  %s1077_s21 = smov 0  }
   0xd   :  { %s1079_s22 = smov 0  }
   0xe LB: > { %1529 = sst [smem:[#allocation13_spill]] %s1002_s15  ;;  %s1113_s23 = sadd.s32 4294967295, %s1030_s22   ;;  %s1030_s22 = sphi %s1079_s22, %s22_s22   ;;  %s1026_s21 = sphi %s1077_s21, %s1565_s21   ;;  %s1022_s20 = sphi %s1075_s20, %s1572_s20   ;;  %s1018_s19 = sphi %s1073_s19, %s1563_s19   ;;  %s1014_s18 = sphi %s1071_s18, %s1571_s18   ;;  %s1010_s17 = sphi %s1069_s17, %s1562_s17   ;;  %s1006_s16 = sphi %s1067_s16, %s1570_s16   ;;  %s1002_s15 = sphi %s1065_s15, %s1569_s15   ;;  %s998_s14 = sphi %s1063_s14, %s1568_s14   ;;  %s994_s13 = sphi %s1061_s13, %s1567_s13   ;;  %s990_s12 = sphi %s1059_s12, %s1566_s12  }
   0xf   : > { %1530 = sst [smem:[#allocation14_spill]] %s1010_s17  ;;  %s31_s24 = sadd.s32 1, %s1022_s20 }
  0x10   : > { %1531 = sst [smem:[#allocation15_spill]] %s1014_s18  ;;  %p1116_p0 = scmp.ge.s32.totalorder %s31_s24, 2 }
  0x11   : > { %1532 = sst [smem:[#allocation16_spill]] %s1018_s19  ;;  %p51_p1 = scmp.eq.s32.totalorder %s1030_s22, 0 }
  0x12   : > { %1533 = sst [smem:[#allocation17_spill]] %s1026_s21  ;;  %p57_p2 = scmp.eq.s32.totalorder %s1113_s23, 0 }
  0x13   : > { %s69_s26 = sadd.s32 1, %s998_s14  ;;  %s1574_s24 = smov (%p1116_p0, %s31_s24), 0 }
  0x14   : > { %1535 = sst [smem:[#allocation18_spill]] %s1574_s24  ;;  %p76_p3 = scmp.ne.s32.totalorder %s998_s14, %s994_s13 }
  0x15   : > { %p82_p4 = scmp.ne.s32.totalorder %s994_s13, %s990_s12  ;;  %s1132_s27 = ssub.s32 %s1022_s20, %s1574_s24 }
  0x16   : > { %p67_p5 = scmp.eq.s32.totalorder %s1132_s27, 0  ;;  %p1137_p6 = por %p76_p3, %p51_p1 }
  0x17   : > { %p1143_p7 = por %p82_p4, %p57_p2  ;;  %p707_p8 = scmp.lt.s32.totalorder %s1030_s22, 4 }
  0x18   : > { %s1149_s30 = scalar_select %p67_p5, %s998_s14, %s69_s26  }
  0x19   : > { %s183_s4 = sand.u32 1, %s1030_s22   ;;  %s1515_s5 = sand.u32 1, %s998_s14  }
  0x1a   : > { %1538 = sst [smem:[#allocation19_spill]] %s1149_s30  ;;  %s674_s6 = sshll.u32 %s1515_s5, 4 }
  0x1b   : > { %s675_s7 = sshll.u32 %s1022_s20, 3  ;;  %s1539_s1 = sld [smem:[#allocation24_spill]] }
  0x1c   : > { %s187_s12 = scalar_lea.vmem [#allocation6], %s674_s6  ;;  %p1163_p9 = pnand %p707_p8, %p1137_p6 }
  0x1d   : > { %s194_s24 = sshll.u32 %s187_s12, 4  ;;  %p676_p10 = scmp.ge.s32.totalorder %s1030_s22, 1  ;;  %s195_s24 = int_to_ptr.vmem [resolvable:$true] %s194_s24 }
  0x1e   : > { %p219_p11 = scmp.lt.s32.totalorder %s1030_s22, 5  ;;  %s1169_s6 = scalar_lea.sflag [#allocation7], %s183_s4 }
  0x1f   : > { %s1517_s8 = smov 128   ;;  %s1518_s9 = smov 8  }
  0x20   : > { %p1177_p12 = pnand %p676_p10, %p219_p11  ;;  %s34_s12 = sadd.s32 1, %s1026_s21 }
  0x21   : > { %s191_s10 = scalar_lea.hbm %s1539_s1, %s675_s7  ;;  %s1516_s7 = smov 256  }
  0x22   : > { %s192_s11 = sshll.u32 %s191_s10, 4  ;;  %s668_s10 = sadd.s32 4294967294, %s1030_s22   ;;  %s193_s11 = int_to_ptr.hbm [resolvable:$true] %s192_s11 }
  0x23   : > { %699 = dma.hbm_to_vmem [thread:$0]  (!%p1163_p9), %s193_s11, 256, %s195_s24, %s1169_s6, %s1516_s7, %s1517_s8, %s1518_s9  }
  0x24   : > { %s43_s4 = sadd.s32 1, %s1010_s17  ;;  %s1576_s12 = smov (!%p1116_p0, %s34_s12), %s1026_s21 }
  0x25   : > { %p50_p13 = scmp.ne.s32.totalorder %s1010_s17, %s1006_s16  ;;  %p56_p3 = scmp.ne.s32.totalorder %s1006_s16, %s1002_s15 }
  0x26   : > { %p36_p4 = scmp.ge.s32.totalorder %s1576_s12, 2  ;;  %p134_p5 = scmp.eq.s32.totalorder %s1113_s23, 3 }
  0x27   : > { %p1194_p6 = por %p51_p1, %p50_p13  ;;  %p1200_p10 = por %p57_p2, %p56_p3 }
  0x28   : > { %s1578_s12 = smov (%p36_p4, %s1576_s12), 0  ;;  %p1206_p0 = por %p134_p5, %p50_p13 }
  0x29   : > { %1544 = sst [smem:[#allocation20_spill]] %s1578_s12  ;;  %p140_p11 = scmp.eq.s32.totalorder %s668_s10, 3 }
  0x2a   : > { %s1545_s25 = scalar_select %p1206_p0, 1, 0 }
  0x2b   : > { %s38_s5 = ssub.s32 %s1026_s21, %s1578_s12  ;;  %s160_s7 = sand.u32 1, %s1010_s17  }
  0x2c   : > { %1546 = sst [smem:[#allocation21_spill]] %s1545_s25  ;;  %s40_s8 = sor.u32 %s1132_s27, %s38_s5 }
  0x2d   : > { %p1214_p1 = por %p140_p11, %p56_p3  ;;  %p41_p2 = scmp.eq.s32.totalorder %s40_s8, 0 }
  0x2e   : > { %s671_s1 = sshll.u32 %s160_s7, 6  ;;  %s672_s30 = sshll.u32 %s1026_s21, 4 }
  0x2f   : > { %s1547_s9 = scalar_select %p1214_p1, 1, 0 }
  0x30   : > { %s1220_s15 = scalar_select %p41_p2, %s1010_s17, %s43_s4  }
  0x31   : > { %1548 = sst [smem:[#allocation22_spill]] %s1547_s9  ;;  %s168_s3 = sadd.s32 %s1022_s20, %s672_s30 }
  0x32   : > { %1549 = sst [smem:[#allocation23_spill]] %s1220_s15  ;;  %s673_s18 = sshll.u32 %s168_s3, 3 }
  0x33   : > { %s164_s10 = scalar_lea.vmem [#allocation3], %s671_s1  ;;  %s170_s27 = scalar_lea.hbm %s1510_s0, %s673_s18 }
  0x34   : > { %s173_s25 = sshll.u32 %s164_s10, 4  ;;  %s171_s5 = sshll.u32 %s170_s27, 4  ;;  %s174_s25 = int_to_ptr.vmem [resolvable:$true] %s173_s25  ;;  %s172_s5 = int_to_ptr.hbm [resolvable:$true] %s171_s5 }
  0x35   : > { %p694_p13 = pnand %p707_p8, %p1194_p6  ;;  %s210_s4 = scalar_lea.hbm %s1512_s2, %s1022_s20 }
  0x36   : > { %s161_s30 = scalar_lea.sflag [#allocation4], %s160_s7  ;;  %s1550_s3 = smov 8  }
  0x37   : > { %s1551_s15 = smov 128   ;;  %s1552_s17 = smov 256  }
  0x38   : > { %696 = dma.hbm_to_vmem [thread:$0]  (!%p694_p13), %s172_s5, 1024, %s174_s25, %s161_s30, %s1552_s17, %s1551_s15, %s1550_s3  }
  0x39   : > { %s212_s1 = sshll.u32 %s210_s4, 4  ;;  %s1553_s10 = sand.u32 1, %s998_s14   ;;  %s213_s1 = int_to_ptr.hbm [resolvable:$true] %s212_s1 }
  0x3a   : > { %s207_s9 = scalar_lea.vmem [#allocation8], %s1553_s10  ;;  %223 = sbr.rel (%p1177_p12) target bundleno = 143 (0x8f), region = 32 }
  0x3b   : > { %s214_s19 = sshll.u32 %s207_s9, 4  ;;  %s1245_s18 = sand.u32 (!%p1177_p12), 1, %s1006_s16   ;;  %s215_s19 = int_to_ptr.vmem [resolvable:$true] %s214_s19 }
  0x3c   : > { %702 = dma.hbm_to_vmem [thread:$0]  (!%p1163_p9), %s213_s1, 16, %s215_s19, %s1169_s6  }
  0x3d   : > { %s677_s21 = sshll.u32 (!%p1177_p12), %s1245_s18, 6  ;;  %s226_s15 = scalar_lea.sflag (!%p1177_p12), [#allocation4], %s1245_s18 }
  0x3e   : > { %s1251_s17 = scalar_lea.vmem (!%p1177_p12), [#allocation3], %s677_s21 }
  0x3f   : > { %977 = dma.done.wait (%p1200_p10), %s226_s15, 1024  }
  0x40   : > { %979 = vsyncadd (%p1200_p10), %s226_s15, 4294966272  ;;  %s235_s26 = sand.u32 1, %s1113_s23   ;;  %s237_s6 = sand.u32 1, %s994_s13  }
  0x41   : > { %s678_s7 = sshll.u32 %s237_s6, 4  ;;  %s236_s9 = scalar_lea.sflag [#allocation7], %s235_s26 }
  0x42   : > { %s1259_s28 = scalar_lea.vmem [#allocation6], %s678_s7 }
  0x43   : > { %981 = dma.done.wait (%p1143_p7), %s236_s9, 272  }
  0x44   : > { %983 = vsyncadd (%p1143_p7), %s236_s9, 4294967024  ;;  %v1035_v0 = vmov 0.0   ;;  %s248_s23 = scalar_lea.vmem [#allocation8], %s237_s6  ;;  %v1266_v1 = vld [vmem:[%s1259_s28] ss:$0 sm:$0xff]  ;;  %v304_v3 = vld [vmem:[%s1251_s17 + $0x8] sm:$0xff] }
  0x45   : > { %281 = vst [vmem:[#allocation2] sm:$0xff] %v1035_v0  ;;  %v303_v2 = vld [vmem:[%s1251_s17] sm:$0xff]  ;;  %v305_v4 = vld [vmem:[%s1251_s17 + $0x10] sm:$0xff]  ;;  %v306_v5 = vld [vmem:[%s1251_s17 + $0x18] sm:$0xff]  ;;  %v335_v7 = vmul.f32 0.0, %v1266_v1  ;;  %s1413_s29 = scalar_lea.vmem [#allocation9], %s677_s21 }
  0x46   : > { %282 = vst [vmem:[#allocation2 + $0x8] sm:$0x3] %v1035_v0  ;;  %v1272_v6 = vld [vmem:[%s248_s23] ss:$0 sm:$0xff]  ;;  %v1276_v8 = vld [vmem:[%s1259_s28 + $0x1] ss:$0 sm:$0xff] }
  0x47   : > { %284 = vst [vmem:[#allocation2 + $0x90] sm:$0xff] %v1035_v0  ;;  %v307_v9 = vld [vmem:[%s1251_s17 + $0x20] sm:$0xff]  ;;  %v308_v12 = vld [vmem:[%s1251_s17 + $0x28] sm:$0xff]  ;;  %v1287_v14 = vld [vmem:[%s1251_s17 + $0x30] sm:$0xff]  ;;  %v343_v16 = vadd.f32 %v1272_v6, %v335_v7  ;;  %v400_v20 = vmul.f32 %v1276_v8, %v303_v2  ;;  %v1306_v24 = vmul.f32 %v1276_v8, %v304_v3  ;;  %v1309_v25 = vmul.f32 %v1276_v8, %v305_v4  ;;  %s1554_s12 = sld [smem:[#allocation16_spill]]  ;;  %s537_s3 = sshll.u32 %s1413_s29, 4  ;;  %s538_s3 = int_to_ptr.vmem [resolvable:$true] %s537_s3 }
  0x48   : > { %285 = vst [vmem:[#allocation2 + $0x98] sm:$0x3] %v1035_v0  ;;  %v1280_v11 = vld [vmem:[%s1259_s28 + $0x4] ss:$0 sm:$0xff]  ;;  %v1284_v13 = vld [vmem:[%s1259_s28 + $0x7] ss:$0 sm:$0xff]  ;;  %v1339_v36 = vmul.f32 %v1276_v8, %v306_v5  ;;  %v1353_v46 = vmul.f32 %v1276_v8, %v307_v9  ;;  %v1363_v49 = vmul.f32 %v1276_v8, %v308_v12 }
  0x49   : > { %287 = vst [vmem:[#allocation2 + $0x10] sm:$0x1] %v1035_v0  ;;  %v1290_v15 = vld [vmem:[%s1251_s17 + $0x38] sm:$0xff]  ;;  %v1294_v17 = vld [vmem:[%s1259_s28 + $0x3] ss:$0 sm:$0xff]  ;;  %v417_v21 = vmul.f32 %v1280_v11, %v303_v2  ;;  %v1303_v23 = vmul.f32 %v1280_v11, %v304_v3  ;;  %v435_v27 = vmul.f32 %v1284_v13, %v304_v3  ;;  %v1317_v28 = vmul.f32 %v1284_v13, %v305_v4  ;;  %s1555_s24 = sld [smem:[#allocation15_spill]] }
  0x4a   : > { %288 = vst [vmem:[#allocation2 + $0x20] sm:$0x1] %v1035_v0  ;;  %v1300_v22 = vld [vmem:[%s1259_s28 + $0x2] ss:$0 sm:$0xff]  ;;  %v1313_v26 = vld [vmem:[%s1259_s28 + $0x6] ss:$0 sm:$0xff]  ;;  %v1320_v29 = vmul.f32 %v1280_v11, %v305_v4  ;;  %v1323_v30 = vmul.f32 %v1280_v11, %v306_v5  ;;  %v1333_v34 = vmul.f32 %v1284_v13, %v306_v5  ;;  %v1336_v35 = vmul.f32 %v1284_v13, %v307_v9 }
  0x4b   : > { %289 = vst [vmem:[#allocation2 + $0x30] sm:$0x1] %v1035_v0  ;;  %v1330_v33 = vld [vmem:[%s1259_s28 + $0x5] ss:$0 sm:$0xff]  ;;  %v1343_v40 = vld [vmem:[%s1259_s28 + $0x8] ss:$0 sm:$0xff]  ;;  %v1347_v42 = vmul.f32 %v1280_v11, %v307_v9  ;;  %v1350_v43 = vmul.f32 %v1284_v13, %v308_v12  ;;  %v1356_v47 = vmul.f32 %v1280_v11, %v308_v12  ;;  %v1360_v48 = vmul.f32 %v1284_v13, %v1287_v14 }
  0x4c   : > { %290 = vst [vmem:[#allocation2 + $0x40] sm:$0x1] %v1035_v0  ;;  %v1373_v59 = vmul.f32 %v1280_v11, %v1287_v14  ;;  %s1556_s4 = sld [smem:[#allocation25_spill]]  ;;  %s524_s19 = scalar_lea.sflag [#allocation5], %s1245_s18 }
  0x4d   : > { %291 = vst [vmem:[#allocation2 + $0x50] sm:$0x1] %v1035_v0  ;;  %v387_v10 = vld [vmem:[#allocation2 + $0x1] sm:$0xff]  ;;  %s681_s11 = sshll.u32 %s1554_s12, 4 }
  0x4e   : > { %292 = vst [vmem:[#allocation2 + $0x60] sm:$0x1] %v1035_v0  ;;  %v399_v18 = vmul.f32 %v1276_v8, %v387_v10  ;;  %v451_v19 = vld [vmem:[#allocation2 + $0x2] sm:$0xff] }
  0x4f   : > { %293 = vst [vmem:[#allocation2 + $0x70] sm:$0x1] %v1035_v0  ;;  %v1327_v32 = vmul.f32 %v1300_v22, %v451_v19  ;;  %s534_s25 = sadd.s32 %s1555_s24, %s681_s11 }
  0x50   : > { %294 = vst [vmem:[#allocation2 + $0x80] sm:$0x1] %v1035_v0  ;;  %s682_s27 = sshll.u32 %s534_s25, 3 }
  0x51   : > { %295 = vst [vmem:[#allocation2 + $0x19] sm:$0x1] %v1035_v0 }
  0x52   : > { %296 = vst [vmem:[#allocation2 + $0x29] sm:$0x1] %v1035_v0  ;;  %s536_s30 = scalar_lea.hbm %s1556_s4, %s682_s27  ;;  %s924_s6 = scalar_lea.hbm %s1556_s4, 256 }
  0x53   : > { %297 = vst [vmem:[#allocation2 + $0x39] sm:$0x1] %v1035_v0  ;;  %s539_s10 = sshll.u32 %s536_s30, 4  ;;  %s540_s10 = int_to_ptr.hbm [resolvable:$true] %s539_s10 }
  0x54   : > { %298 = vst [vmem:[#allocation2 + $0x49] sm:$0x1] %v1035_v0  ;;  %s918_s21 = sshra.s32 %s540_s10, 4  ;;  %s919_s21 = int_to_ptr.hbm [resolvable:$true] %s918_s21 }
  0x55   : > { %299 = vst [vmem:[#allocation2 + $0x59] sm:$0x1] %v1035_v0  ;;  %s920_s15 = scalar_lea.hbm %s919_s21, 64  ;;  %p925_p12 = scmp.lt.s32.totalorder %s919_s21, %s1556_s4 }
  0x56   : > { %300 = vst [vmem:[#allocation2 + $0x69] sm:$0x1] %v1035_v0  ;;  %p921_p7 = scmp.ne.s32.totalorder %s919_s21, %s920_s15  ;;  %p926_p3 = scmp.lt.s32.totalorder %s924_s6, %s920_s15 }
  0x57   : > { %301 = vst [vmem:[#allocation2 + $0x79] sm:$0x1] %v1035_v0 }
  0x58   : > { %302 = vst [vmem:[#allocation2 + $0x89] sm:$0x1] %v1035_v0  ;;  %p922_p8 = pnand %p921_p7, %p1206_p0  ;;  %p927_p4 = por %p926_p3, %p925_p12 }
  0x59   : > { %311 = vst [vmem:[#allocation2 + $0x11] sm:$0xff] %v303_v2 }
  0x5a   : > { %312 = vst [vmem:[#allocation2 + $0x21] sm:$0xff] %v304_v3  ;;  %p923_p9 = pneg %p922_p8 }
  0x5b   : > { %313 = vst [vmem:[#allocation2 + $0x31] sm:$0xff] %v305_v4 }
  0x5c   : > { %314 = vst [vmem:[#allocation2 + $0x41] sm:$0xff] %v306_v5  ;;  %p928_p5 = pnand %p927_p4, %p923_p9 }
  0x5d   : > { %315 = vst [vmem:[#allocation2 + $0x51] sm:$0xff] %v307_v9 }
  0x5e   : > { %316 = vst [vmem:[#allocation2 + $0x61] sm:$0xff] %v308_v12 }
  0x5f   : > { %317 = vst [vmem:[#allocation2 + $0x71] sm:$0xff] %v1287_v14 }
  0x60   : > { %318 = vst [vmem:[#allocation2 + $0x81] sm:$0xff] %v1290_v15  ;;  %v324_v31 = vld [vmem:[#allocation2 + $0x10] sm:$0xff] }
  0x61   : > { %v325_v37 = vld [vmem:[#allocation2 + $0x20] sm:$0xff]  ;;  %v353_v38 = vmul.f32 %v1294_v17, %v324_v31  ;;  %v452_v39 = vld [vmem:[#allocation2 + $0x12] sm:$0xff]  ;;  %v336_v41 = vmul.f32 %v1266_v1, %v324_v31 }
  0x62   : > { %v453_v44 = vld [vmem:[#allocation2 + $0x22] sm:$0xff]  ;;  %v326_v45 = vld [vmem:[#allocation2 + $0x30] sm:$0xff]  ;;  %v371_v51 = vmul.f32 %v1313_v26, %v325_v37  ;;  %v354_v53 = vmul.f32 %v1294_v17, %v325_v37  ;;  %v481_v54 = vmul.f32 %v1330_v33, %v452_v39  ;;  %v464_v56 = vmul.f32 %v1300_v22, %v452_v39 }
  0x63   : > { %v361_v50 = vadd.f32 %v353_v38, %v343_v16  ;;  %v344_v52 = vadd.f32 %v1272_v6, %v336_v41  ;;  %v454_v55 = vld [vmem:[#allocation2 + $0x32] sm:$0xff]  ;;  %v327_v57 = vld [vmem:[#allocation2 + $0x40] sm:$0xff]  ;;  %v337_v58 = vmul.f32 %v1266_v1, %v325_v37  ;;  %v499_v61 = vmul.f32 %v1343_v40, %v453_v44 }
  0x64   : > { %v372_v63 = vmul.f32 %v1313_v26, %v326_v45  ;;  %v482_v0 = vmul.f32 %v1330_v33, %v453_v44  ;;  %v355_v3 = vmul.f32 %v1294_v17, %v326_v45  ;;  %v328_v4 = vld [vmem:[#allocation2 + $0x50] sm:$0xff]  ;;  %v338_v5 = vmul.f32 %v1266_v1, %v326_v45 }
  0x65   : > { %v379_v60 = vadd.f32 %v371_v51, %v361_v50  ;;  %v362_v62 = vadd.f32 %v354_v53, %v344_v52  ;;  %v345_v2 = vadd.f32 %v1272_v6, %v337_v58  ;;  %v500_v10 = vmul.f32 %v1343_v40, %v454_v55  ;;  %v329_v37 = vld [vmem:[#allocation2 + $0x60] sm:$0xff] }
  0x66   : > { %v373_v12 = vmul.f32 %v1313_v26, %v327_v57  ;;  %v346_v19 = vadd.f32 %v1272_v6, %v338_v5  ;;  %v356_v31 = vmul.f32 %v1294_v17, %v327_v57  ;;  %v339_v38 = vmul.f32 %v1266_v1, %v327_v57  ;;  %v455_v51 = vld [vmem:[#allocation2 + $0x42] sm:$0xff] }
  0x67   : > { %v407_v7 = vadd.f32 %v399_v18, %v379_v60  ;;  %v380_v9 = vadd.f32 %v372_v63, %v362_v62  ;;  %v363_v16 = vadd.f32 %v355_v3, %v345_v2  ;;  %v465_v50 = vmul.f32 %v1300_v22, %v453_v44  ;;  %v330_v2 = vld [vmem:[#allocation2 + $0x70] sm:$0xff] }
  0x68   : > { %v374_v45 = vmul.f32 %v1313_v26, %v328_v4  ;;  %v364_v52 = vadd.f32 %v356_v31, %v346_v19  ;;  %v347_v53 = vadd.f32 %v1272_v6, %v339_v38  ;;  %v357_v58 = vmul.f32 %v1294_v17, %v328_v4 }
  0x69   : > { %v425_v39 = vadd.f32 %v417_v21, %v407_v7  ;;  %v408_v41 = vadd.f32 %v400_v20, %v380_v9  ;;  %v381_v18 = vadd.f32 %v373_v12, %v363_v16  ;;  %v483_v63 = vmul.f32 %v1330_v33, %v454_v55 }
  0x6a   : > { %v375_v57 = vmul.f32 %v1313_v26, %v329_v37  ;;  %v382_v21 = vadd.f32 %v374_v45, %v364_v52  ;;  %v365_v44 = vadd.f32 %v357_v58, %v347_v53  ;;  %v340_v3 = vmul.f32 %v1266_v1, %v328_v4  ;;  %v331_v58 = vld [vmem:[#allocation2 + $0x80] sm:$0xff] }
  0x6b   : > { %v443_v60 = vadd.f32 %v435_v27, %v425_v39  ;;  %v426_v62 = vadd.f32 %v1303_v23, %v408_v41  ;;  %v409_v20 = vadd.f32 %v1306_v24, %v381_v18  ;;  %v501_v9 = vmul.f32 %v1343_v40, %v455_v51 }
  0x6c   : > { %v358_v27 = vmul.f32 %v1294_v17, %v329_v37  ;;  %v410_v12 = vadd.f32 %v1309_v25, %v382_v21  ;;  %v383_v16 = vadd.f32 %v375_v57, %v365_v44  ;;  %v348_v24 = vadd.f32 %v1272_v6, %v340_v3 }
  0x6d   : > { %v471_v5 = vadd.f32 %v1327_v32, %v443_v60  ;;  %v444_v7 = vadd.f32 %v1317_v28, %v426_v62  ;;  %v427_v23 = vadd.f32 %v1320_v29, %v409_v20  ;;  %v466_v38 = vmul.f32 %v1300_v22, %v454_v55  ;;  %v456_v55 = vld [vmem:[#allocation2 + $0x52] sm:$0xff] }
  0x6e   : > { %v376_v32 = vmul.f32 %v1313_v26, %v330_v2  ;;  %v428_v4 = vadd.f32 %v1323_v30, %v410_v12  ;;  %v411_v39 = vadd.f32 %v1339_v36, %v383_v16  ;;  %v366_v41 = vadd.f32 %v358_v27, %v348_v24 }
  0x6f   : > { %v489_v19 = vadd.f32 %v481_v54, %v471_v5  ;;  %v472_v31 = vadd.f32 %v464_v56, %v444_v7  ;;  %v445_v28 = vadd.f32 %v1333_v34, %v427_v23  ;;  %v484_v25 = vmul.f32 %v1330_v33, %v455_v51  ;;  %v458_v23 = vld [vmem:[#allocation2 + $0x72] sm:$0xff] }
  0x70   : > { %v341_v18 = vmul.f32 %v1266_v1, %v329_v37  ;;  %v446_v56 = vadd.f32 %v1336_v35, %v428_v4  ;;  %v429_v52 = vadd.f32 %v1347_v42, %v411_v39  ;;  %v384_v53 = vadd.f32 %v376_v32, %v366_v41  ;;  %v457_v42 = vld [vmem:[#allocation2 + $0x62] sm:$0xff] }
  0x71   : > { %v507_v29 = vadd.f32 %v499_v61, %v489_v19  ;;  %v490_v45 = vadd.f32 %v482_v0, %v472_v31  ;;  %v473_v54 = vadd.f32 %v465_v50, %v445_v28  ;;  %v467_v34 = vmul.f32 %v1300_v22, %v455_v51  ;;  %v459_v39 = vld [vmem:[#allocation2 + $0x82] sm:$0xff] }
  0x72   : > { %v349_v36 = vadd.f32 %v1272_v6, %v341_v18  ;;  %v359_v61 = vmul.f32 %v1294_v17, %v330_v2  ;;  %v474_v35 = vadd.f32 %v466_v38, %v446_v56  ;;  %v447_v37 = vadd.f32 %v1350_v43, %v429_v52  ;;  %v396_v38 = vld [vmem:[#allocation2 + $0x91] sm:$0xff] }
  0x73   : > { %515 = vst [vmem:[%s1413_s29] sm:$0xff] %v507_v29  ;;  %v508_v30 = vadd.f32 %v500_v10, %v490_v45  ;;  %v491_v0 = vadd.f32 %v483_v63, %v473_v54  ;;  %v412_v50 = vadd.f32 %v1353_v46, %v384_v53  ;;  %v502_v60 = vmul.f32 %v1343_v40, %v456_v55  ;;  %v460_v56 = vld [vmem:[#allocation2 + $0x92] sm:$0xff] }
  0x74   : > { %v485_v62 = vmul.f32 %v1330_v33, %v456_v55  ;;  %v367_v10 = vadd.f32 %v359_v61, %v349_v36  ;;  %v377_v51 = vmul.f32 %v1313_v26, %v331_v58  ;;  %v492_v20 = vadd.f32 %v484_v25, %v474_v35 }
  0x75   : > { %516 = vst [vmem:[%s1413_s29 + $0x8] sm:$0xff] %v508_v30  ;;  %v509_v57 = vadd.f32 %v501_v9, %v491_v0  ;;  %v475_v21 = vadd.f32 %v467_v34, %v447_v37  ;;  %v430_v63 = vadd.f32 %v1356_v47, %v412_v50  ;;  %v503_v43 = vmul.f32 %v1343_v40, %v457_v42 }
  0x76   : > { %v385_v44 = vadd.f32 %v377_v51, %v367_v10  ;;  %v342_v3 = vmul.f32 %v1266_v1, %v330_v2  ;;  %v360_v46 = vmul.f32 %v1294_v17, %v331_v58  ;;  %v510_v5 = vadd.f32 %v502_v60, %v492_v20 }
  0x77   : > { %517 = vst [vmem:[%s1413_s29 + $0x10] sm:$0xff] %v509_v57  ;;  %v493_v7 = vadd.f32 %v485_v62, %v475_v21  ;;  %v448_v27 = vadd.f32 %v1360_v48, %v430_v63  ;;  %v468_v9 = vmul.f32 %v1300_v22, %v456_v55  ;;  %v441_v47 = vmul.f32 %v1284_v13, %v1290_v15 }
  0x78   : > { %v413_v12 = vadd.f32 %v1363_v49, %v385_v44  ;;  %v350_v16 = vadd.f32 %v1272_v6, %v342_v3  ;;  %v378_v1 = vmul.f32 0.0, %v1313_v26  ;;  %518 = vst [vmem:[%s1413_s29 + $0x18] sm:$0xff] %v510_v5  ;;  %v486_v24 = vmul.f32 %v1330_v33, %v457_v42 }
  0x79   : > { %v511_v17 = vadd.f32 %v503_v43, %v493_v7  ;;  %v476_v2 = vadd.f32 %v468_v9, %v448_v27  ;;  %v406_v49 = vmul.f32 %v1276_v8, %v1287_v14  ;;  %v504_v6 = vmul.f32 %v1343_v40, %v458_v23 }
  0x7a   : > { %v431_v48 = vadd.f32 %v1373_v59, %v413_v12  ;;  %v368_v19 = vadd.f32 %v360_v46, %v350_v16  ;;  %v469_v32 = vmul.f32 %v1300_v22, %v457_v42  ;;  %v424_v4 = vmul.f32 %v1280_v11, %v1290_v15 }
  0x7b   : > { %519 = vst [vmem:[%s1413_s29 + $0x20] sm:$0xff] %v511_v17  ;;  %v494_v31 = vadd.f32 %v486_v24, %v476_v2  ;;  %v487_v8 = vmul.f32 %v1330_v33, %v458_v23  ;;  %v442_v29 = vmul.f32 %v1284_v13, %v396_v38  ;;  %v505_v25 = vmul.f32 %v1343_v40, %v459_v39 }
  0x7c   : > { %v449_v26 = vadd.f32 %v441_v47, %v431_v48  ;;  %v386_v28 = vadd.f32 %v378_v1, %v368_v19  ;;  %v470_v15 = vmul.f32 %v1300_v22, %v458_v23  ;;  %v488_v55 = vmul.f32 %v1330_v33, %v459_v39 }
  0x7d   : > { %v512_v59 = vadd.f32 %v504_v6, %v494_v31  ;;  %v506_v53 = vmul.f32 %v1343_v40, %v460_v56 }
  0x7e   : > { %v477_v41 = vadd.f32 %v469_v32, %v449_v26  ;;  %v414_v14 = vadd.f32 %v406_v49, %v386_v28 }
  0x7f   : > { %520 = vst [vmem:[%s1413_s29 + $0x28] sm:$0xff] %v512_v59 }
  0x80   : > { %v495_v45 = vadd.f32 %v487_v8, %v477_v41  ;;  %v432_v18 = vadd.f32 %v424_v4, %v414_v14 }
  0x82   : > { %v513_v54 = vadd.f32 %v505_v25, %v495_v45  ;;  %v450_v11 = vadd.f32 %v442_v29, %v432_v18 }
  0x84   : > { %521 = vst [vmem:[%s1413_s29 + $0x30] sm:$0xff] %v513_v54  ;;  %v478_v13 = vadd.f32 %v470_v15, %v450_v11 }
  0x86   : > { %v496_v52 = vadd.f32 %v488_v55, %v478_v13 }
  0x88   : > { %v514_v58 = vadd.f32 %v506_v53, %v496_v52 }
  0x8a   : > { %522 = vst [vmem:[%s1413_s29 + $0x38] sm:$0xff] %v514_v58 }
  0x8b   : > { %931 = shalt.err (!%p928_p5)
}
  0x8c   : > { %s1036_s18 = smov 128   ;;  %s1037_s28 = smov 256  }
  0x8d   : > { %s1038_s23 = smov 8  }
  0x8e   : > { %691 = dma.vmem_to_hbm [thread:$0]  (%p1206_p0), %s538_s3, 1024, %s540_s10, %s524_s19, %s1036_s18, %s1037_s28, %s1038_s23  }
  0x8f PF: > { %s1558_s29 = sld [smem:[#allocation13_spill]]  ;;  %p708_p6 = scmp.ge.s32.totalorder %s1030_s22, 2 }
  0x91   : > { %p704_p10 = pnand %p708_p6, %p1214_p1 }
  0x93   : > { %p705_p11 = pneg %p704_p10 }
  0x95   : > { %s554_s24 = sand.u32 1, %s1558_s29  }
  0x96   : > { %s555_s11 = scalar_lea.sflag [#allocation5], %s554_s24 }
  0x97   : > { %985 = dma.done.wait (%p705_p11), %s555_s11, 1024  }
  0x98   : > { %987 = vsyncadd (%p705_p11), %s555_s11, 4294966272  ;;  %s22_s22 = sadd.s32 1, %s1030_s22   ;;  %s1560_s25 = sld [smem:[#allocation19_spill]] }
  0x99   : > { %p19_p2 = scmp.ge.s32.totalorder %s22_s22, 6   ;;  %s1561_s27 = sld [smem:[#allocation14_spill]] }
  0x9a   : > { %s1562_s17 = sld [smem:[#allocation23_spill]]  ;;  %s1566_s12 = smov %s994_s13 }
  0x9b   : > { %s1563_s19 = sld [smem:[#allocation17_spill]]  ;;  %s1567_s13 = smov %s998_s14 }
  0x9c   : > { %s1564_s5 = sld [smem:[#allocation18_spill]]  ;;  %s1569_s15 = smov %s1006_s16 }
  0x9d   : > { %s1565_s21 = sld [smem:[#allocation20_spill]]  ;;  %s1571_s18 = smov %s1022_s20 }
  0x9e   : > { %s1568_s14 = smov %s1560_s25  ;;  %21 = sbr.rel (!%p19_p2) target bundleno = 14 (0xe), region = 103 }
  0x9f   : > { %s1570_s16 = smov %s1561_s27 }
  0xa2   : > { %s1572_s20 = smov %s1564_s5 }
  0xa3   :  { %561 = vsyncpa [#allocation4], 1 }
  0xa4   :  { %563 = vsyncpa [#allocation4 + $0x1], 1 }
  0xa5   :  { %564 = vsyncpa [#allocation7], 1 }
  0xa6   :  { %566 = vsyncpa [#allocation7 + $0x1], 1 }
  0xa7   :  { %567 = vsyncpa [#allocation5], 1 }
  0xa8   :  { %569 = vsyncpa [#allocation5 + $0x1], 1 }

</bundles_post_ra>
